<compile_context>
chip_gen: v7x
topology: tpu7x:2x2x1
jax: 0.10.0
libtpu: 0.0.40
codegen_flags: <defaults>
</compile_context>

<pallas_src>
import functools

import jax
import jax.numpy as jnp
from jax import lax
from jax.experimental import pallas as pl
from jax.experimental.pallas import tpu as pltpu


# ---------------------------------------------------------------------------
# Kernel 1: fused Q/K/V projection with the score scale folded into q.
#   x2d: (M, D) with M = B*S; wq/wk/wv: (D, D); bq/bk/bv: (1, D)
#   -> q_scaled, k, v : (M, D) each
# ---------------------------------------------------------------------------
def _qkv_proj_kernel(x_ref, wq_ref, bq_ref, wk_ref, bk_ref, wv_ref, bv_ref,
                     q_ref, k_ref, v_ref, *, scale):
    x = x_ref[...]  # (TM, D) tile, loaded once, feeds all three MXU matmuls.
    q = jnp.dot(x, wq_ref[...], preferred_element_type=jnp.float32) + bq_ref[...]
    # Fold the 1/input_dim**2 score scale into q (exact for power-of-two scales):
    # (q*scale) @ k^T == (q @ k^T) * scale, so attention-kernel inner loop stays
    # multiply-free.
    q_ref[...] = (q * scale).astype(q_ref.dtype)
    k = jnp.dot(x, wk_ref[...], preferred_element_type=jnp.float32) + bk_ref[...]
    k_ref[...] = k.astype(k_ref.dtype)
    v = jnp.dot(x, wv_ref[...], preferred_element_type=jnp.float32) + bv_ref[...]
    v_ref[...] = v.astype(v_ref.dtype)


def _qkv_projection(x2d, wq, bq, wk, bk, wv, bv, *, scale, tm):
    M, D = x2d.shape
    kernel = functools.partial(_qkv_proj_kernel, scale=scale)
    row_spec = pl.BlockSpec((tm, D), lambda i: (i, 0))   # x rows / q,k,v rows
    w_spec = pl.BlockSpec((D, D), lambda i: (0, 0))      # weights (VMEM-resident)
    b_spec = pl.BlockSpec((1, D), lambda i: (0, 0))      # biases (VMEM-resident)
    return pl.pallas_call(
        kernel,
        out_shape=(jax.ShapeDtypeStruct((M, D), x2d.dtype),) * 3,
        grid_spec=pltpu.PrefetchScalarGridSpec(
            num_scalar_prefetch=0,
            grid=(pl.cdiv(M, tm),),
            in_specs=[row_spec, w_spec, b_spec, w_spec, b_spec, w_spec, b_spec],
            out_specs=(row_spec, row_spec, row_spec),
        ),
        compiler_params=pltpu.CompilerParams(dimension_semantics=("parallel",)),
    )(x2d, wq, bq, wk, bk, wv, bv)


# ---------------------------------------------------------------------------
# Kernel 2: flash-style attention (online softmax, no (S, S) materialization).
#   q (pre-scaled) / k / v: (B, S, D)  ->  out: (B, S, D)
# ---------------------------------------------------------------------------
def _flash_attn_kernel(q_ref, k_ref, v_ref, o_ref, m_sc, l_sc, acc_sc):
    kv = pl.program_id(2)

    @pl.when(kv == 0)
    def _init():
        m_sc[...] = jnp.full(m_sc.shape, -jnp.inf, dtype=m_sc.dtype)
        l_sc[...] = jnp.zeros(l_sc.shape, dtype=l_sc.dtype)
        acc_sc[...] = jnp.zeros(acc_sc.shape, dtype=acc_sc.dtype)

    # scores (BB, TQ, TK): contract the feature dim of q and k directly — the
    # "k^T" is absorbed into the MXU operand feed, no transpose is materialized.
    # q was pre-scaled by 1/input_dim**2 in the projection kernel.
    s = lax.dot_general(
        q_ref[...], k_ref[...],
        dimension_numbers=(((2,), (2,)), ((0,), (0,))),
        preferred_element_type=jnp.float32,
    )

    m_prev = m_sc[...]
    m_new = jnp.maximum(m_prev, jnp.max(s, axis=-1, keepdims=True))
    alpha = jnp.exp(m_prev - m_new)          # rescale of previous partials
    p = jnp.exp(s - m_new)                   # f32 softmax numerator (VPU/EUP)
    l_sc[...] = alpha * l_sc[...] + jnp.sum(p, axis=-1, keepdims=True)
    acc_sc[...] = alpha * acc_sc[...] + lax.dot_general(
        p.astype(v_ref.dtype), v_ref[...],   # feed MXU in v's dtype, accumulate f32
        dimension_numbers=(((2,), (1,)), ((0,), (0,))),
        preferred_element_type=jnp.float32,
    )
    m_sc[...] = m_new

    @pl.when(kv == pl.num_programs(2) - 1)
    def _finalize():
        # approx=True -> single EUP vrcp in an otherwise idle VLIW slot.
        inv_l = pl.reciprocal(l_sc[...], approx=True)
        o_ref[...] = (acc_sc[...] * inv_l).astype(o_ref.dtype)


def _flash_attention(q, k, v, *, bb, tq, tk):
    B, S, D = q.shape
    grid = (B // bb, S // tq, S // tk)
    return pl.pallas_call(
        _flash_attn_kernel,
        out_shape=jax.ShapeDtypeStruct((B, S, D), q.dtype),
        grid_spec=pltpu.PrefetchScalarGridSpec(
            num_scalar_prefetch=0,
            grid=grid,
            in_specs=[
                pl.BlockSpec((bb, tq, D), lambda b, qi, ki: (b, qi, 0)),  # q tile
                pl.BlockSpec((bb, tk, D), lambda b, qi, ki: (b, ki, 0)),  # k tile
                pl.BlockSpec((bb, tk, D), lambda b, qi, ki: (b, ki, 0)),  # v tile
            ],
            out_specs=pl.BlockSpec((bb, tq, D), lambda b, qi, ki: (b, qi, 0)),
            scratch_shapes=[
                pltpu.VMEM((bb, tq, 1), jnp.float32),  # running max   m
                pltpu.VMEM((bb, tq, 1), jnp.float32),  # running denom l
                pltpu.VMEM((bb, tq, D), jnp.float32),  # output accumulator
            ],
        ),
        compiler_params=pltpu.CompilerParams(
            dimension_semantics=("parallel", "parallel", "arbitrary")),
    )(q, k, v)


# ---------------------------------------------------------------------------
# Tiling heuristics (static, shape-derived Python ints).
# ---------------------------------------------------------------------------
def _largest_tile(total, target):
    """Largest divisor of `total` that is <= target and a multiple of 8 (else total)."""
    if total <= target:
        return total
    for t in range(target, 7, -1):
        if total % t == 0 and t % 8 == 0:
            return t
    return total


def _choose_attention_tiles(B, S, D, itemsize):
    # MXU-aligned sequence tiles (256 fills a v6e/v7x MXU tile, 2x128 on v5e).
    tq = _largest_tile(S, 256)
    tk = _largest_tile(S, 256)
    # Fold several batch elements into one grid step while per-step blocks stay
    # small: amortizes the ~0.35 us per-grid-step overhead for tiny problems and
    # keeps VMEM bounded (well under v7x's 64 MiB) for big ones.
    per_batch = (2 * tq * D + 2 * tk * D + tq * tk) * itemsize
    bb = max(1, min(B, (2 * 1024 * 1024) // max(per_batch, 1)))
    while B % bb:
        bb -= 1
    return bb, tq, tk


@jax.jit
def self_attention(x, wq, bq, wk, bk, wv, bv):
    """x: (B, S, D); weights (D, D) stored as (in, out); biases (1, D)."""
    B, S, D = x.shape
    scale = 1.0 / float(D) ** 2  # module semantics: scores / input_dim**2

    # --- Phase 1: Q/K/V projections with batch collapsed into the M dimension. ---
    x2d = x.reshape(B * S, D)
    tm = B * S if B * S <= 256 else 256  # partial last block is fine (row-wise op)
    q2, k2, v2 = _qkv_projection(x2d, wq, bq, wk, bk, wv, bv, scale=scale, tm=tm)
    q = q2.reshape(B, S, D)   # contiguous reshapes — no data movement
    k = k2.reshape(B, S, D)
    v = v2.reshape(B, S, D)

    # --- Phase 2: flash-style attention, never materializing (S, S). ---
    bb, tq, tk = _choose_attention_tiles(B, S, D, x.dtype.itemsize)
    return _flash_attention(q, k, v, bb=bb, tq=tq, tk=tk)


def _reference(x, wq, bq, wk, bk, wv, bv):
    D = x.shape[-1]
    q = x @ wq + bq
    k = x @ wk + bk
    v = x @ wv + bv
    scores = jnp.einsum("bsd,btd->bst", q, k) / (D ** 2)
    attn = jax.nn.softmax(scores, axis=2)
    return jnp.einsum("bst,btd->bsd", attn, v)


if __name__ == "__main__":
    B, S, D = 2, 8, 32  # batch, sequence length, input_dim

    key = jax.random.PRNGKey(0)
    kx, kq, kbq, kk, kbk, kv, kbv = jax.random.split(key, 7)

    x = jax.random.normal(kx, (B, S, D), dtype=jnp.float32)

    # Deterministic parameter init (mimics nn.Linear uniform(-1/sqrt(D), 1/sqrt(D))).
    bound = 1.0 / (D ** 0.5)
    # Weights stored as (in, out), i.e. the transpose of PyTorch's (out, in) layout.
    wq = jax.random.uniform(kq, (D, D), minval=-bound, maxval=bound, dtype=jnp.float32)
    wk = jax.random.uniform(kk, (D, D), minval=-bound, maxval=bound, dtype=jnp.float32)
    wv = jax.random.uniform(kv, (D, D), minval=-bound, maxval=bound, dtype=jnp.float32)
    bq = jax.random.uniform(kbq, (1, D), minval=-bound, maxval=bound, dtype=jnp.float32)
    bk = jax.random.uniform(kbk, (1, D), minval=-bound, maxval=bound, dtype=jnp.float32)
    bv = jax.random.uniform(kbv, (1, D), minval=-bound, maxval=bound, dtype=jnp.float32)

    out = self_attention(x, wq, bq, wk, bk, wv, bv)
    out = jax.block_until_ready(out)

    ref = _reference(x, wq, bq, wk, bk, wv, bv)
    assert out.shape == (B, S, D)
    # Everything is exact f32 (the score scale is a power of two, folded into q)
    # except the EUP approx reciprocal used for the softmax normalizer, hence
    # the few-1e-3 tolerance.
    assert jnp.allclose(out, ref, atol=5e-3, rtol=5e-3), "mismatch vs reference"

    print("KERNEL_OK")
</pallas_src>

<mosaic_0001>
module attributes {stable_mosaic.version = 11 : i64} {
  func.func @_qkv_proj_kernel(%arg0: i32, %arg1: memref<16x32xf32, #tpu.memory_space<vmem>>, %arg2: memref<32x32xf32, #tpu.memory_space<vmem>>, %arg3: memref<1x32xf32, #tpu.memory_space<vmem>>, %arg4: memref<32x32xf32, #tpu.memory_space<vmem>>, %arg5: memref<1x32xf32, #tpu.memory_space<vmem>>, %arg6: memref<32x32xf32, #tpu.memory_space<vmem>>, %arg7: memref<1x32xf32, #tpu.memory_space<vmem>>, %arg8: memref<16x32xf32, #tpu.memory_space<vmem>>, %arg9: memref<16x32xf32, #tpu.memory_space<vmem>>, %arg10: memref<16x32xf32, #tpu.memory_space<vmem>>) attributes {dimension_semantics = [#tpu.dimension_semantics<parallel>], iteration_bounds = array<i64: 1>, scalar_prefetch = 0 : i64, scratch_operands = 0 : i64, tpu.core_type = #tpu.core_type<tc>, window_params = [{transform_indices = @transform_0, window_bounds = array<i64: 16, 32>}, {pipeline_mode = #tpu.pipeline_mode<synchronous>, transform_indices = @transform_1, window_bounds = array<i64: 32, 32>}, {pipeline_mode = #tpu.pipeline_mode<synchronous>, transform_indices = @transform_2, window_bounds = array<i64: 1, 32>}, {pipeline_mode = #tpu.pipeline_mode<synchronous>, transform_indices = @transform_3, window_bounds = array<i64: 32, 32>}, {pipeline_mode = #tpu.pipeline_mode<synchronous>, transform_indices = @transform_4, window_bounds = array<i64: 1, 32>}, {pipeline_mode = #tpu.pipeline_mode<synchronous>, transform_indices = @transform_5, window_bounds = array<i64: 32, 32>}, {pipeline_mode = #tpu.pipeline_mode<synchronous>, transform_indices = @transform_6, window_bounds = array<i64: 1, 32>}, {transform_indices = @transform_7, window_bounds = array<i64: 16, 32>}, {transform_indices = @transform_8, window_bounds = array<i64: 16, 32>}, {transform_indices = @transform_9, window_bounds = array<i64: 16, 32>}]} {
    %c0 = arith.constant 0 : index
    %c0_0 = arith.constant 0 : index
    %0 = vector.load %arg1[%c0, %c0_0] : memref<16x32xf32, #tpu.memory_space<vmem>>, vector<16x32xf32>
    %c0_1 = arith.constant 0 : index
    %c0_2 = arith.constant 0 : index
    %1 = vector.load %arg2[%c0_1, %c0_2] : memref<32x32xf32, #tpu.memory_space<vmem>>, vector<32x32xf32>
    %cst = arith.constant dense<0.000000e+00> : vector<16x32xf32>
    %2 = tpu.matmul %0, %1, %cst {dimension_numbers = #tpu.dot_dimension_numbers<[1], [0], [0], [1], [0, 0, 1, 1], [], []>} : vector<16x32xf32>, vector<32x32xf32>, vector<16x32xf32> -> vector<16x32xf32>
    %c0_3 = arith.constant 0 : index
    %c0_4 = arith.constant 0 : index
    %3 = vector.load %arg3[%c0_3, %c0_4] : memref<1x32xf32, #tpu.memory_space<vmem>>, vector<1x32xf32>
    %4 = vector.broadcast %3 : vector<1x32xf32> to vector<16x32xf32>
    %5 = arith.addf %2, %4 : vector<16x32xf32>
    %cst_5 = arith.constant 9.765625E-4 : f32
    %6 = vector.broadcast %cst_5 : f32 to vector<16x32xf32>
    %7 = arith.mulf %5, %6 : vector<16x32xf32>
    %c0_6 = arith.constant 0 : index
    %c0_7 = arith.constant 0 : index
    %8 = vector.load %arg8[%c0_6, %c0_7] : memref<16x32xf32, #tpu.memory_space<vmem>>, vector<16x32xf32>
    tpu.vector_store %arg8[%c0_6, %c0_7], %7 {strides = array<i32>} : memref<16x32xf32, #tpu.memory_space<vmem>>, vector<16x32xf32>,
    %c0_8 = arith.constant 0 : index
    %c0_9 = arith.constant 0 : index
    %9 = vector.load %arg4[%c0_8, %c0_9] : memref<32x32xf32, #tpu.memory_space<vmem>>, vector<32x32xf32>
    %cst_10 = arith.constant dense<0.000000e+00> : vector<16x32xf32>
    %10 = tpu.matmul %0, %9, %cst_10 {dimension_numbers = #tpu.dot_dimension_numbers<[1], [0], [0], [1], [0, 0, 1, 1], [], []>} : vector<16x32xf32>, vector<32x32xf32>, vector<16x32xf32> -> vector<16x32xf32>
    %c0_11 = arith.constant 0 : index
    %c0_12 = arith.constant 0 : index
    %11 = vector.load %arg5[%c0_11, %c0_12] : memref<1x32xf32, #tpu.memory_space<vmem>>, vector<1x32xf32>
    %12 = vector.broadcast %11 : vector<1x32xf32> to vector<16x32xf32>
    %13 = arith.addf %10, %12 : vector<16x32xf32>
    %c0_13 = arith.constant 0 : index
    %c0_14 = arith.constant 0 : index
    %14 = vector.load %arg9[%c0_13, %c0_14] : memref<16x32xf32, #tpu.memory_space<vmem>>, vector<16x32xf32>
    tpu.vector_store %arg9[%c0_13, %c0_14], %13 {strides = array<i32>} : memref<16x32xf32, #tpu.memory_space<vmem>>, vector<16x32xf32>,
    %c0_15 = arith.constant 0 : index
    %c0_16 = arith.constant 0 : index
    %15 = vector.load %arg6[%c0_15, %c0_16] : memref<32x32xf32, #tpu.memory_space<vmem>>, vector<32x32xf32>
    %cst_17 = arith.constant dense<0.000000e+00> : vector<16x32xf32>
    %16 = tpu.matmul %0, %15, %cst_17 {dimension_numbers = #tpu.dot_dimension_numbers<[1], [0], [0], [1], [0, 0, 1, 1], [], []>} : vector<16x32xf32>, vector<32x32xf32>, vector<16x32xf32> -> vector<16x32xf32>
    %c0_18 = arith.constant 0 : index
    %c0_19 = arith.constant 0 : index
    %17 = vector.load %arg7[%c0_18, %c0_19] : memref<1x32xf32, #tpu.memory_space<vmem>>, vector<1x32xf32>
    %18 = vector.broadcast %17 : vector<1x32xf32> to vector<16x32xf32>
    %19 = arith.addf %16, %18 : vector<16x32xf32>
    %c0_20 = arith.constant 0 : index
    %c0_21 = arith.constant 0 : index
    %20 = vector.load %arg10[%c0_20, %c0_21] : memref<16x32xf32, #tpu.memory_space<vmem>>, vector<16x32xf32>
    tpu.vector_store %arg10[%c0_20, %c0_21], %19 {strides = array<i32>} : memref<16x32xf32, #tpu.memory_space<vmem>>, vector<16x32xf32>,
    return
  }
  func.func @transform_0(%arg0: i32) -> (i32, i32) {
    %c0_i32 = arith.constant 0 : i32
    %c0_i32_0 = arith.constant 0 : i32
    return %arg0, %c0_i32 : i32, i32
  }
  func.func @transform_1(%arg0: i32) -> (i32, i32) {
    %c0_i32 = arith.constant 0 : i32
    %c0_i32_0 = arith.constant 0 : i32
    %c0_i32_1 = arith.constant 0 : i32
    return %c0_i32, %c0_i32_0 : i32, i32
  }
  func.func @transform_2(%arg0: i32) -> (i32, i32) {
    %c0_i32 = arith.constant 0 : i32
    %c0_i32_0 = arith.constant 0 : i32
    %c0_i32_1 = arith.constant 0 : i32
    return %c0_i32, %c0_i32_0 : i32, i32
  }
  func.func @transform_3(%arg0: i32) -> (i32, i32) {
    %c0_i32 = arith.constant 0 : i32
    %c0_i32_0 = arith.constant 0 : i32
    %c0_i32_1 = arith.constant 0 : i32
    return %c0_i32, %c0_i32_0 : i32, i32
  }
  func.func @transform_4(%arg0: i32) -> (i32, i32) {
    %c0_i32 = arith.constant 0 : i32
    %c0_i32_0 = arith.constant 0 : i32
    %c0_i32_1 = arith.constant 0 : i32
    return %c0_i32, %c0_i32_0 : i32, i32
  }
  func.func @transform_5(%arg0: i32) -> (i32, i32) {
    %c0_i32 = arith.constant 0 : i32
    %c0_i32_0 = arith.constant 0 : i32
    %c0_i32_1 = arith.constant 0 : i32
    return %c0_i32, %c0_i32_0 : i32, i32
  }
  func.func @transform_6(%arg0: i32) -> (i32, i32) {
    %c0_i32 = arith.constant 0 : i32
    %c0_i32_0 = arith.constant 0 : i32
    %c0_i32_1 = arith.constant 0 : i32
    return %c0_i32, %c0_i32_0 : i32, i32
  }
  func.func @transform_7(%arg0: i32) -> (i32, i32) {
    %c0_i32 = arith.constant 0 : i32
    %c0_i32_0 = arith.constant 0 : i32
    return %arg0, %c0_i32 : i32, i32
  }
  func.func @transform_8(%arg0: i32) -> (i32, i32) {
    %c0_i32 = arith.constant 0 : i32
    %c0_i32_0 = arith.constant 0 : i32
    return %arg0, %c0_i32 : i32, i32
  }
  func.func @transform_9(%arg0: i32) -> (i32, i32) {
    %c0_i32 = arith.constant 0 : i32
    %c0_i32_0 = arith.constant 0 : i32
    return %arg0, %c0_i32 : i32, i32
  }
}

module attributes {stable_mosaic.version = 11 : i64} {
  func.func @_flash_attn_kernel(%arg0: i32, %arg1: i32, %arg2: i32, %arg3: memref<2x8x32xf32, #tpu.memory_space<vmem>>, %arg4: memref<2x8x32xf32, #tpu.memory_space<vmem>>, %arg5: memref<2x8x32xf32, #tpu.memory_space<vmem>>, %arg6: memref<2x8x32xf32, #tpu.memory_space<vmem>>, %arg7: memref<2x8x1xf32, #tpu.memory_space<vmem>>, %arg8: memref<2x8x1xf32, #tpu.memory_space<vmem>>, %arg9: memref<2x8x32xf32, #tpu.memory_space<vmem>>) attributes {dimension_semantics = [#tpu.dimension_semantics<parallel>, #tpu.dimension_semantics<parallel>, #tpu.dimension_semantics<arbitrary>], iteration_bounds = array<i64: 1, 1, 1>, scalar_prefetch = 0 : i64, scratch_operands = 3 : i64, tpu.core_type = #tpu.core_type<tc>, window_params = [{transform_indices = @transform_0, window_bounds = array<i64: 2, 8, 32>}, {transform_indices = @transform_1, window_bounds = array<i64: 2, 8, 32>}, {transform_indices = @transform_2, window_bounds = array<i64: 2, 8, 32>}, {transform_indices = @transform_3, window_bounds = array<i64: 2, 8, 32>}]} {
    %c0_i32 = arith.constant 0 : i32
    %0 = arith.cmpi eq, %arg2, %c0_i32 : i32
    %1 = arith.extui %0 : i1 to i32
    %c0_i32_0 = arith.constant 0 : i32
    %2 = arith.cmpi ne, %1, %c0_i32_0 : i32
    scf.if %2 {
      %cst_32 = arith.constant 0xFF800000 : f32
      %32 = vector.broadcast %cst_32 : f32 to vector<2x8x1xf32>
      %c0_33 = arith.constant 0 : index
      %c0_34 = arith.constant 0 : index
      %c0_35 = arith.constant 0 : index
      %33 = vector.load %arg7[%c0_33, %c0_34, %c0_35] : memref<2x8x1xf32, #tpu.memory_space<vmem>>, vector<2x8x1xf32>
      tpu.vector_store %arg7[%c0_33, %c0_34, %c0_35], %32 {strides = array<i32>} : memref<2x8x1xf32, #tpu.memory_space<vmem>>, vector<2x8x1xf32>,
      %cst_36 = arith.constant 0.000000e+00 : f32
      %34 = vector.broadcast %cst_36 : f32 to vector<2x8x1xf32>
      %c0_37 = arith.constant 0 : index
      %c0_38 = arith.constant 0 : index
      %c0_39 = arith.constant 0 : index
      %35 = vector.load %arg8[%c0_37, %c0_38, %c0_39] : memref<2x8x1xf32, #tpu.memory_space<vmem>>, vector<2x8x1xf32>
      tpu.vector_store %arg8[%c0_37, %c0_38, %c0_39], %34 {strides = array<i32>} : memref<2x8x1xf32, #tpu.memory_space<vmem>>, vector<2x8x1xf32>,
      %cst_40 = arith.constant 0.000000e+00 : f32
      %36 = vector.broadcast %cst_40 : f32 to vector<2x8x32xf32>
      %c0_41 = arith.constant 0 : index
      %c0_42 = arith.constant 0 : index
      %c0_43 = arith.constant 0 : index
      %37 = vector.load %arg9[%c0_41, %c0_42, %c0_43] : memref<2x8x32xf32, #tpu.memory_space<vmem>>, vector<2x8x32xf32>
      tpu.vector_store %arg9[%c0_41, %c0_42, %c0_43], %36 {strides = array<i32>} : memref<2x8x32xf32, #tpu.memory_space<vmem>>, vector<2x8x32xf32>,
    } else {
    }
    %c0 = arith.constant 0 : index
    %c0_1 = arith.constant 0 : index
    %c0_2 = arith.constant 0 : index
    %3 = vector.load %arg3[%c0, %c0_1, %c0_2] : memref<2x8x32xf32, #tpu.memory_space<vmem>>, vector<2x8x32xf32>
    %c0_3 = arith.constant 0 : index
    %c0_4 = arith.constant 0 : index
    %c0_5 = arith.constant 0 : index
    %4 = vector.load %arg4[%c0_3, %c0_4, %c0_5] : memref<2x8x32xf32, #tpu.memory_space<vmem>>, vector<2x8x32xf32>
    %cst = arith.constant dense<0.000000e+00> : vector<2x8x8xf32>
    %5 = tpu.matmul %3, %4, %cst {dimension_numbers = #tpu.dot_dimension_numbers<[2], [2], [1], [1], [0, 0, 0, 1, 1, 1], [0], [0]>} : vector<2x8x32xf32>, vector<2x8x32xf32>, vector<2x8x8xf32> -> vector<2x8x8xf32>
    %c0_6 = arith.constant 0 : index
    %c0_7 = arith.constant 0 : index
    %c0_8 = arith.constant 0 : index
    %6 = vector.load %arg7[%c0_6, %c0_7, %c0_8] : memref<2x8x1xf32, #tpu.memory_space<vmem>>, vector<2x8x1xf32>
    %cst_9 = arith.constant dense<0xFF800000> : vector<2x8xf32>
    %7 = vector.multi_reduction <maximumf>, %5, %cst_9 [2] : vector<2x8x8xf32> to vector<2x8xf32>
    %8 = vector.shape_cast %7 : vector<2x8xf32> to vector<2x8x1xf32>
    %9 = arith.maximumf %6, %8 : vector<2x8x1xf32>
    %10 = arith.subf %6, %9 : vector<2x8x1xf32>
    %11 = math.exp %10 : vector<2x8x1xf32>
    %12 = vector.broadcast %9 : vector<2x8x1xf32> to vector<2x8x8xf32>
    %13 = arith.subf %5, %12 : vector<2x8x8xf32>
    %14 = math.exp %13 : vector<2x8x8xf32>
    %c0_10 = arith.constant 0 : index
    %c0_11 = arith.constant 0 : index
    %c0_12 = arith.constant 0 : index
    %15 = vector.load %arg8[%c0_10, %c0_11, %c0_12] : memref<2x8x1xf32, #tpu.memory_space<vmem>>, vector<2x8x1xf32>
    %16 = arith.mulf %11, %15 : vector<2x8x1xf32>
    %cst_13 = arith.constant dense<0.000000e+00> : vector<2x8xf32>
    %17 = vector.multi_reduction <add>, %14, %cst_13 [2] : vector<2x8x8xf32> to vector<2x8xf32>
    %18 = vector.shape_cast %17 : vector<2x8xf32> to vector<2x8x1xf32>
    %19 = arith.addf %16, %18 : vector<2x8x1xf32>
    %c0_14 = arith.constant 0 : index
    %c0_15 = arith.constant 0 : index
    %c0_16 = arith.constant 0 : index
    %20 = vector.load %arg8[%c0_14, %c0_15, %c0_16] : memref<2x8x1xf32, #tpu.memory_space<vmem>>, vector<2x8x1xf32>
    tpu.vector_store %arg8[%c0_14, %c0_15, %c0_16], %19 {strides = array<i32>} : memref<2x8x1xf32, #tpu.memory_space<vmem>>, vector<2x8x1xf32>,
    %c0_17 = arith.constant 0 : index
    %c0_18 = arith.constant 0 : index
    %c0_19 = arith.constant 0 : index
    %21 = vector.load %arg9[%c0_17, %c0_18, %c0_19] : memref<2x8x32xf32, #tpu.memory_space<vmem>>, vector<2x8x32xf32>
    %22 = vector.broadcast %11 : vector<2x8x1xf32> to vector<2x8x32xf32>
    %23 = arith.mulf %22, %21 : vector<2x8x32xf32>
    %c0_20 = arith.constant 0 : index
    %c0_21 = arith.constant 0 : index
    %c0_22 = arith.constant 0 : index
    %24 = vector.load %arg5[%c0_20, %c0_21, %c0_22] : memref<2x8x32xf32, #tpu.memory_space<vmem>>, vector<2x8x32xf32>
    %cst_23 = arith.constant dense<0.000000e+00> : vector<2x8x32xf32>
    %25 = tpu.matmul %14, %24, %cst_23 {dimension_numbers = #tpu.dot_dimension_numbers<[2], [1], [1], [2], [0, 0, 0, 1, 1, 2], [0], [0]>} : vector<2x8x8xf32>, vector<2x8x32xf32>, vector<2x8x32xf32> -> vector<2x8x32xf32>
    %26 = arith.addf %23, %25 : vector<2x8x32xf32>
    %c0_24 = arith.constant 0 : index
    %c0_25 = arith.constant 0 : index
    %c0_26 = arith.constant 0 : index
    %27 = vector.load %arg9[%c0_24, %c0_25, %c0_26] : memref<2x8x32xf32, #tpu.memory_space<vmem>>, vector<2x8x32xf32>
    tpu.vector_store %arg9[%c0_24, %c0_25, %c0_26], %26 {strides = array<i32>} : memref<2x8x32xf32, #tpu.memory_space<vmem>>, vector<2x8x32xf32>,
    %c0_27 = arith.constant 0 : index
    %c0_28 = arith.constant 0 : index
    %c0_29 = arith.constant 0 : index
    %28 = vector.load %arg7[%c0_27, %c0_28, %c0_29] : memref<2x8x1xf32, #tpu.memory_space<vmem>>, vector<2x8x1xf32>
    tpu.vector_store %arg7[%c0_27, %c0_28, %c0_29], %9 {strides = array<i32>} : memref<2x8x1xf32, #tpu.memory_space<vmem>>, vector<2x8x1xf32>,
    %c0_i32_30 = arith.constant 0 : i32
    %29 = arith.cmpi eq, %arg2, %c0_i32_30 : i32
    %30 = arith.extui %29 : i1 to i32
    %c0_i32_31 = arith.constant 0 : i32
    %31 = arith.cmpi ne, %30, %c0_i32_31 : i32
    scf.if %31 {
      %c0_32 = arith.constant 0 : index
      %c0_33 = arith.constant 0 : index
      %c0_34 = arith.constant 0 : index
      %32 = vector.load %arg8[%c0_32, %c0_33, %c0_34] : memref<2x8x1xf32, #tpu.memory_space<vmem>>, vector<2x8x1xf32>
      %33 = tpu.reciprocal %32 {approx = true} : vector<2x8x1xf32> -> vector<2x8x1xf32>
      %c0_35 = arith.constant 0 : index
      %c0_36 = arith.constant 0 : index
      %c0_37 = arith.constant 0 : index
      %34 = vector.load %arg9[%c0_35, %c0_36, %c0_37] : memref<2x8x32xf32, #tpu.memory_space<vmem>>, vector<2x8x32xf32>
      %35 = vector.broadcast %33 : vector<2x8x1xf32> to vector<2x8x32xf32>
      %36 = arith.mulf %34, %35 : vector<2x8x32xf32>
      %c0_38 = arith.constant 0 : index
      %c0_39 = arith.constant 0 : index
      %c0_40 = arith.constant 0 : index
      %37 = vector.load %arg6[%c0_38, %c0_39, %c0_40] : memref<2x8x32xf32, #tpu.memory_space<vmem>>, vector<2x8x32xf32>
      tpu.vector_store %arg6[%c0_38, %c0_39, %c0_40], %36 {strides = array<i32>} : memref<2x8x32xf32, #tpu.memory_space<vmem>>, vector<2x8x32xf32>,
    } else {
    }
    return
  }
  func.func @transform_0(%arg0: i32, %arg1: i32, %arg2: i32) -> (i32, i32, i32) {
    %c0_i32 = arith.constant 0 : i32
    %c0_i32_0 = arith.constant 0 : i32
    return %arg0, %arg1, %c0_i32 : i32, i32, i32
  }
  func.func @transform_1(%arg0: i32, %arg1: i32, %arg2: i32) -> (i32, i32, i32) {
    %c0_i32 = arith.constant 0 : i32
    %c0_i32_0 = arith.constant 0 : i32
    return %arg0, %arg2, %c0_i32 : i32, i32, i32
  }
  func.func @transform_2(%arg0: i32, %arg1: i32, %arg2: i32) -> (i32, i32, i32) {
    %c0_i32 = arith.constant 0 : i32
    %c0_i32_0 = arith.constant 0 : i32
    return %arg0, %arg2, %c0_i32 : i32, i32, i32
  }
  func.func @transform_3(%arg0: i32, %arg1: i32, %arg2: i32) -> (i32, i32, i32) {
    %c0_i32 = arith.constant 0 : i32
    %c0_i32_0 = arith.constant 0 : i32
    return %arg0, %arg1, %c0_i32 : i32, i32, i32
  }
}

</mosaic_0001>

<bundles_post_ra>
// kernel: self_attention.3
= control target key start
LH: loop header
LB: loop body
LE: loop exit
PB: predicated region body
PF: predicated region fallthrough
CT: control target
= control target key end

     0   :  { %vm24_vm0 = vcmask 261120   ;;  %v518_v2 = vmov 0.0   ;;  %vm519_vm1 = vmmov 0   ;;  %s599_s0 = inlined_call_operand.vmem [shape: f32[2,8,32], index: 0, kind: input, shape index: {}]   ;;  %s600_s1 = inlined_call_operand.vmem [shape: f32[2,8,32], index: 1, kind: input, shape index: {}]   ;;  %s601_s2 = inlined_call_operand.vmem [shape: f32[2,8,32], index: 2, kind: input, shape index: {}]   ;;  %s602_s3 = inlined_call_operand.hbm [shape: f32[2,8,32], index: 3, kind: output, shape index: {}]  }
   0x1   :  { %v29_v0 = vld [vmem:[%s600_s1] sm:$0xff]  ;;  %v30_v1 = vld [vmem:[%s600_s1 + $0x8] sm:$0xff]  ;;  %453 = vmatprep.subr.mxu0 %v518_v2  ;;  %25 = vst.msk [vmem:[#allocation4] sm:$0xff] %vm24_vm0, %v518_v2  ;;  %26 = vst.msk [vmem:[#allocation4 + $0x8] sm:$0xff] %vm24_vm0, %v518_v2  ;;  %455 = vmatprep.mubr.msk.f32.mxu0 %vm519_vm1, %v518_v2 }
   0x2   :  { %8 = vsyncpa [#allocation6], 0  ;;  %454 = vmatpush3.xpose.msk.msra.mxu0 %vm24_vm0, %v29_v0  ;;  %458 = vmatprep.subr.mxu1 %v518_v2  ;;  %v27_v3 = vld [vmem:[%s599_s0] sm:$0xff]  ;;  %v28_v4 = vld [vmem:[%s599_s0 + $0x8] sm:$0xff]  ;;  %vm186_vm2 = vcmask 64512   ;;  %vm19_vm3 = vcmask 7168  }
   0x3   :  { %459 = vmatpush3.xpose.msk.msra.mxu1 %vm24_vm0, %v30_v1  ;;  %460 = vmatprep.mubr.msk.f32.mxu1 %vm519_vm1, %v518_v2  ;;  %v520_v11 = vmov -inf   ;;  %22 = vst.msk [vmem:[#allocation3] sm:$0xff] %vm19_vm3, %v518_v2  ;;  %23 = vst.msk [vmem:[#allocation3 + $0x8] sm:$0xff] %vm19_vm3, %v518_v2  ;;  %v521_v12 = vmov 0   ;;  %v246_v21 = vld [vmem:[%s601_s2] sm:$0xff]  ;;  %v247_v22 = vld [vmem:[%s601_s2 + $0x8] sm:$0xff] }
   0x4   :  { %463 = vmatprep.subr.mxu0 %v518_v2  ;;  %468 = vmatprep.subr.mxu1 %v518_v2  ;;  %20 = vst.msk [vmem:[#allocation2] sm:$0xff] %vm19_vm3, %v520_v11  ;;  %21 = vst.msk [vmem:[#allocation2 + $0x8] sm:$0xff] %vm19_vm3, %v520_v11  ;;  %s522_s2 = smov [#allocation5]  }
   0x5   :  { %456 = vmatmul.mubr.msk.f32.vlgmr.msra.gmra.mrb[0].mxu0 %vm24_vm0, %v27_v3  ;;  %480 = vset.pattern.permute.xlu1 %v521_v12  ;;  %s428_s22 = sshll.u32 %s522_s2, 4  ;;  %s429_s22 = int_to_ptr.vmem [resolvable:$true] %s428_s22 }
   0x6   :  { %461 = vmatmul.mubr.msk.f32.vlgmr.msra.gmra.mrb[0].mxu1 %vm24_vm0, %v28_v4  ;;  %465 = vmatprep.mubr.msk.f32.mxu0 %vm519_vm1, %v518_v2  ;;  %s494_s23 = scalar_lea.vmem %s429_s22, 256  ;;  %p499_p1 = scmp.lt.s32.totalorder %s429_s22, %s429_s22 }
   0x7   :  { %470 = vmatprep.mubr.msk.f32.mxu1 %vm519_vm1, %v518_v2  ;;  %481 = vset.pattern.permute.xlu0 %v521_v12  ;;  %p495_p0 = scmp.ne.s32.totalorder %s429_s22, %s494_s23  ;;  %p500_p2 = scmp.lt.s32.totalorder %s494_s23, %s494_s23 }
   0x8   :  { %464 = vmatpush3.msra.mxu0 %v246_v21  ;;  %469 = vmatpush3.msra.mxu1 %v247_v22  ;;  %v232_v49 = vld [vmem:[#allocation4] sm:$0xff]  ;;  %v233_v52 = vld [vmem:[#allocation4 + $0x8] sm:$0xff] }
   0x9   :  { %p501_p3 = por %p500_p2, %p499_p1 }
   0xa   :  { %v217_v37 = vld [vmem:[#allocation3] sm:$0xff]  ;;  %v218_v40 = vld [vmem:[#allocation3 + $0x8] sm:$0xff] }
   0xb   :  { %v184_v13 = vld [vmem:[#allocation2] sm:$0xff]  ;;  %v185_v16 = vld [vmem:[#allocation2 + $0x8] sm:$0xff]  ;;  %p502_p4 = pnand %p501_p3, %p495_p0 }
  0xd8   :  { %v104_v5 = vpop.f32.mrb[0].mxu0 }
  0xd9   :  { %v457_v6 = vpop.f32.mrb[1].mxu0  ;;  %v187_v7 = vsel %vm186_vm2, %v104_v5, -inf  ;;  %v180_v8 = vpop.f32.mrb[0].mxu1 }
  0xda   :  { %188 = vmax.xlane.f32.xlu0 %v187_v7  ;;  %v462_v9 = vpop.f32.mrb[1].mxu1  ;;  %v190_v10 = vsel %vm186_vm2, %v180_v8, -inf }
  0xde   :  { %191 = vmax.xlane.f32.xlu0 %v190_v10 }
 0x167   :  { %v189_v14 = vpop.xlane.xlu0 %188 }
 0x168   :  { %v193_v15 = vmax.f32 %v184_v13, %v189_v14 }
 0x16a   :  { %v195_v17 = vsub.f32 %v184_v13, %v193_v15  ;;  %398 = vst.msk [vmem:[#allocation2] sm:$0xff] %vm19_vm3, %v193_v15  ;;  %203 = vperm.xlu1 %480, %v193_v15  }
 0x16b   :  { %v192_v18 = vpop.xlane.xlu0 %191 }
 0x16c   :  { %v194_v19 = vmax.f32 %v185_v16, %v192_v18  ;;  %v197_v34 = vmul.f32 1.442695, %v195_v17 }
 0x16e   :  { %v196_v20 = vsub.f32 %v185_v16, %v194_v19  ;;  %399 = vst.msk [vmem:[#allocation2 + $0x8] sm:$0xff] %vm19_vm3, %v194_v19  ;;  %208 = vperm.xlu1 %480, %v194_v19  }
 0x170   :  { %v199_v33 = vmul.f32 1.442695, %v196_v20 }
 0x1e9   :  { %v204_v23 = vpop.permute.xlu1 %203 }
 0x1ea   :  { %v211_v24 = vsub.f32 %v104_v5, %v204_v23 }
 0x1ec   :  { %v213_v25 = vmul.f32 1.442695, %v211_v24 }
 0x1ed   :  { %v209_v26 = vpop.permute.xlu1 %208 }
 0x1ee   :  { %482 = vpow2.f32 %v213_v25  ;;  %v212_v27 = vsub.f32 %v180_v8, %v209_v26 }
 0x1f0   :  { %v215_v28 = vmul.f32 1.442695, %v212_v27 }
 0x1f2   :  { %484 = vpow2.f32 %v215_v28 }
 0x1f3   :  { %486 = vpow2.f32 %v199_v33 }
 0x1f4   :  { %488 = vpow2.f32 %v197_v34 }
 0x1f8   :  { %v483_v29 = vpop.eup %482 }
 0x1f9   :  { %466 = vmatmul.mubr.msk.f32.vlgmr.msra.gmra.mrb[2].mxu0 %vm186_vm2, %v483_v29  ;;  %v221_v30 = vsel %vm186_vm2, %v483_v29, 0.0 }
 0x1fa   :  { %222 = vadd.xlane.f32.xlu0 %v221_v30 }
 0x1fc   :  { %v485_v31 = vpop.eup %484 }
 0x1fd   :  { %471 = vmatmul.mubr.msk.f32.vlgmr.msra.gmra.mrb[2].mxu1 %vm186_vm2, %v485_v31  ;;  %v224_v32 = vsel %vm186_vm2, %v485_v31, 0.0  ;;  %v487_v35 = vpop.eup %486 }
 0x1fe   :  { %225 = vadd.xlane.f32.xlu1 %v224_v32  ;;  %v489_v36 = vpop.eup %488  ;;  %v220_v42 = vmul.f32 %v487_v35, %v218_v40 }
 0x1ff   :  { %v219_v38 = vmul.f32 %v489_v36, %v217_v37 }
 0x20f   :  { %241 = vperm.xlu1 %480, %v487_v35  }
 0x210   :  { %236 = vperm.xlu0 %481, %v489_v36  }
 0x287   :  { %v223_v39 = vpop.xlane.xlu0 %222 }
 0x288   :  { %v227_v41 = vadd.f32 %v223_v39, %v219_v38 }
 0x28a   :  { %230 = vst.msk [vmem:[#allocation3] sm:$0xff] %vm19_vm3, %v227_v41 }
 0x28b   :  { %v226_v43 = vpop.xlane.xlu1 %225 }
 0x28c   :  { %v228_v44 = vadd.f32 %v226_v43, %v220_v42 }
 0x28e   :  { %231 = vst.msk [vmem:[#allocation3 + $0x8] sm:$0xff] %vm19_vm3, %v228_v44 }
 0x28f   :  { %v237_v50 = vpop.permute.xlu0 %236  ;;  %v242_v53 = vpop.permute.xlu1 %241 }
 0x290   :  { %v244_v51 = vmul.f32 %v237_v50, %v232_v49  ;;  %v245_v57 = vmul.f32 %v242_v53, %v233_v52 }
 0x291   :  { %v403_v45 = vld [vmem:[#allocation3] sm:$0xff] }
 0x292   :  { %490 = vrcp.f32 %v403_v45 }
 0x295   :  { %v404_v46 = vld [vmem:[#allocation3 + $0x8] sm:$0xff] }
 0x296   :  { %492 = vrcp.f32 %v404_v46 }
 0x29c   :  { %v491_v47 = vpop.eup %490 }
 0x29d   :  { %411 = vperm.xlu0 %481, %v491_v47  }
 0x2a0   :  { %v493_v48 = vpop.eup %492 }
 0x2a1   :  { %416 = vperm.xlu0 %481, %v493_v48  }
 0x2cc   :  { %v317_v54 = vpop.f32.mrb[2].mxu0 }
 0x2cd   :  { %v394_v55 = vadd.f32 %v317_v54, %v244_v51  ;;  %v467_v56 = vpop.f32.mrb[3].mxu0 }
 0x2cf   :  { %396 = vst.msk [vmem:[#allocation4] sm:$0xff] %vm24_vm0, %v394_v55 }
 0x2d0   :  { %v390_v58 = vpop.f32.mrb[2].mxu1 }
 0x2d1   :  { %v395_v59 = vadd.f32 %v390_v58, %v245_v57  ;;  %v472_v60 = vpop.f32.mrb[3].mxu1 }
 0x2d3   :  { %397 = vst.msk [vmem:[#allocation4 + $0x8] sm:$0xff] %vm24_vm0, %v395_v59 }
 0x2d6   :  { %v407_v61 = vld [vmem:[#allocation4] sm:$0xff] }
 0x2da   :  { %v408_v0 = vld [vmem:[#allocation4 + $0x8] sm:$0xff] }
 0x31c   :  { %v412_v62 = vpop.permute.xlu0 %411 }
 0x31d   :  { %v419_v63 = vmul.f32 %v412_v62, %v407_v61 }
 0x31f   :  { %421 = vst.msk [vmem:[#allocation5] sm:$0xff] %vm24_vm0, %v419_v63 }
 0x320   :  { %v417_v1 = vpop.permute.xlu0 %416 }
 0x321   :  { %v420_v2 = vmul.f32 %v417_v1, %v408_v0 }
 0x323   :  { %422 = vst.msk [vmem:[#allocation5 + $0x8] sm:$0xff] %vm24_vm0, %v420_v2 }
 0x324   :  { %505 = shalt.err (!%p502_p4)
}
 0x325   :  { %s506_s26 = scalar_lea.hbm %s602_s3, 256 }
 0x326   :  { %p507_p5 = scmp.ne.s32.totalorder %s602_s3, %s506_s26  ;;  %p510_p6 = scmp.lt.u32.totalorder %s506_s26, %s602_s3 }
 0x328   :  { %p512_p7 = pnand %p510_p6, %p507_p5 }
 0x32a   :  { %515 = shalt.err (!%p512_p7)
}
 0x32b   :  { %s523_s4 = smov 128   ;;  %s524_s5 = smov 8  }
 0x32c   :  { %434 = dma.vmem_to_hbm [thread:$0]  %s429_s22, 256, %s602_s3, [#allocation6], %s523_s4, %s523_s4, %s524_s5  }
 0x32d   :  { %516 = dma.done.wait [#allocation6], 256  }
 0x32e   :  { %517 = vsyncadd [#allocation6], 4294967040 }
 0x32f   :  { %438 = vsyncpa [#allocation6], 1 }

// kernel: self_attention.2
= control target key start
LH: loop header
LB: loop body
LE: loop exit
PB: predicated region body
PF: predicated region fallthrough
CT: control target
= control target key end

     0   :  { %15 = vsyncpa [#allocation3], 0  ;;  %s727_s0 = inlined_call_operand.hbm [shape: f32[16,32], index: 0, kind: input, shape index: {}]   ;;  %s728_s1 = inlined_call_operand.hbm [shape: f32[32,32], index: 1, kind: input, shape index: {}]   ;;  %s729_s2 = inlined_call_operand.vmem [shape: f32[1,32], index: 2, kind: input, shape index: {}]   ;;  %s730_s3 = inlined_call_operand.hbm [shape: f32[32,32], index: 3, kind: input, shape index: {}]   ;;  %s731_s4 = inlined_call_operand.vmem [shape: f32[1,32], index: 4, kind: input, shape index: {}]   ;;  %s732_s5 = inlined_call_operand.hbm [shape: f32[32,32], index: 5, kind: input, shape index: {}]   ;;  %s733_s6 = inlined_call_operand.vmem [shape: f32[1,32], index: 6, kind: input, shape index: {}]   ;;  %s734_s7 = inlined_call_operand.vmem [shape: f32[16,32], index: 7, kind: output, shape index: {0}]   ;;  %s735_s8 = inlined_call_operand.vmem [shape: f32[16,32], index: 8, kind: output, shape index: {1}]   ;;  %s736_s9 = inlined_call_operand.vmem [shape: f32[16,32], index: 9, kind: output, shape index: {2}]  }
   0x1   :  { %16 = vsyncpa [#allocation5], 0 }
   0x2   :  { %17 = vsyncpa [#allocation8], 0  ;;  %s558_s30 = smov [#allocation4]   ;;  %s559_s11 = smov [#allocation2]  }
   0x3   :  { %s35_s10 = sshll.u32 %s558_s30, 4  ;;  %s23_s12 = sshll.u32 %s559_s11, 4  ;;  %s36_s10 = int_to_ptr.vmem [resolvable:$true] %s35_s10  ;;  %s614_s12 = int_to_ptr.vmem [resolvable:$true] %s23_s12 }
   0x4   :  { %s464_s15 = scalar_lea.hbm %s728_s1, 512 }
   0x5   :  { %p465_p0 = scmp.ne.s32.totalorder %s728_s1, %s464_s15  ;;  %p468_p1 = scmp.lt.u32.totalorder %s464_s15, %s728_s1 }
   0x7   :  { %p470_p2 = pnand %p468_p1, %p465_p0 }
   0x9   :  { %473 = shalt.err (!%p470_p2)
}
   0xa   :  { %s474_s20 = scalar_lea.vmem %s36_s10, 512  ;;  %p479_p4 = scmp.lt.s32.totalorder %s36_s10, %s36_s10 }
   0xb   :  { %p475_p3 = scmp.ne.s32.totalorder %s36_s10, %s474_s20  ;;  %p480_p5 = scmp.lt.s32.totalorder %s474_s20, %s474_s20 }
   0xd   :  { %p481_p6 = por %p480_p5, %p479_p4 }
   0xf   :  { %p482_p7 = pnand %p481_p6, %p475_p3 }
  0x11   :  { %485 = shalt.err (!%p482_p7)
}
  0x12   :  { %s560_s21 = smov 128   ;;  %s561_s22 = smov 8  }
  0x13   :  { %41 = dma.hbm_to_vmem [thread:$0]  %s728_s1, 512, %s36_s10, [#allocation5], %s560_s21, %s560_s21, %s561_s22  }
  0x14   :  { %s486_s27 = scalar_lea.hbm %s727_s0, 256 }
  0x15   :  { %p487_p8 = scmp.ne.s32.totalorder %s727_s0, %s486_s27  ;;  %p490_p9 = scmp.lt.u32.totalorder %s486_s27, %s727_s0 }
  0x17   :  { %p492_p10 = pnand %p490_p9, %p487_p8 }
  0x19   :  { %495 = shalt.err (!%p492_p10)
}
  0x1a   :  { %s496_s13 = scalar_lea.vmem %s614_s12, 256  ;;  %p501_p12 = scmp.lt.s32.totalorder %s614_s12, %s614_s12 }
  0x1b   :  { %p497_p11 = scmp.ne.s32.totalorder %s614_s12, %s496_s13  ;;  %p502_p13 = scmp.lt.s32.totalorder %s496_s13, %s496_s13 }
  0x1d   :  { %p503_p0 = por %p502_p13, %p501_p12 }
  0x1f   :  { %p504_p1 = pnand %p503_p0, %p497_p11 }
  0x21   :  { %507 = shalt.err (!%p504_p1)
}
  0x22   :  { %29 = dma.hbm_to_vmem [thread:$0]  %s727_s0, 256, %s614_s12, [#allocation3], %s560_s21, %s560_s21, %s561_s22  }
  0x23   :  { %s562_s14 = smov [#allocation6]   ;;  %s563_s16 = smov [#allocation7]  }
  0x24   :  { %s49_s15 = sshll.u32 %s562_s14, 4  ;;  %s63_s17 = sshll.u32 %s563_s16, 4  ;;  %s50_s15 = int_to_ptr.vmem [resolvable:$true] %s49_s15  ;;  %s651_s17 = int_to_ptr.vmem [resolvable:$true] %s63_s17 }
  0x25   :  { %s508_s20 = scalar_lea.hbm %s730_s3, 512 }
  0x26   :  { %p509_p2 = scmp.ne.s32.totalorder %s730_s3, %s508_s20  ;;  %p512_p3 = scmp.lt.u32.totalorder %s508_s20, %s730_s3 }
  0x28   :  { %p514_p4 = pnand %p512_p3, %p509_p2 }
  0x2a   :  { %517 = shalt.err (!%p514_p4)
}
  0x2b   :  { %s518_s0 = scalar_lea.vmem %s50_s15, 512  ;;  %p523_p6 = scmp.lt.s32.totalorder %s50_s15, %s50_s15 }
  0x2c   :  { %p519_p5 = scmp.ne.s32.totalorder %s50_s15, %s518_s0  ;;  %p524_p7 = scmp.lt.s32.totalorder %s518_s0, %s518_s0 }
  0x2e   :  { %p525_p8 = por %p524_p7, %p523_p6 }
  0x30   :  { %p526_p9 = pnand %p525_p8, %p519_p5 }
  0x32   :  { %529 = shalt.err (!%p526_p9)
}
  0x33   :  { %55 = dma.hbm_to_vmem [thread:$0]  %s730_s3, 512, %s50_s15, [#allocation5], %s560_s21, %s560_s21, %s561_s22  }
  0x34   :  { %s530_s30 = scalar_lea.hbm %s732_s5, 512 }
  0x35   :  { %p531_p10 = scmp.ne.s32.totalorder %s732_s5, %s530_s30  ;;  %p534_p11 = scmp.lt.u32.totalorder %s530_s30, %s732_s5 }
  0x37   :  { %p536_p12 = pnand %p534_p11, %p531_p10 }
  0x39   :  { %539 = shalt.err (!%p536_p12)
}
  0x3a   :  { %s540_s14 = scalar_lea.vmem %s651_s17, 512  ;;  %p545_p0 = scmp.lt.s32.totalorder %s651_s17, %s651_s17 }
  0x3b   :  { %p541_p13 = scmp.ne.s32.totalorder %s651_s17, %s540_s14  ;;  %p546_p1 = scmp.lt.s32.totalorder %s540_s14, %s540_s14 }
  0x3d   :  { %p547_p2 = por %p546_p1, %p545_p0 }
  0x3f   :  { %p548_p3 = pnand %p547_p2, %p541_p13 }
  0x41   :  { %551 = shalt.err (!%p548_p3)
}
  0x42   :  { %69 = dma.hbm_to_vmem [thread:$0]  %s732_s5, 512, %s651_s17, [#allocation8], %s560_s21, %s560_s21, %s561_s22  }
  0x43   :  { %552 = dma.done.wait [#allocation3], 256  }
  0x44   :  { %553 = vsyncadd [#allocation3], 4294967040 }
  0x45   :  { %554 = dma.done.wait [#allocation5], 1024  }
  0x46   :  { %555 = vsyncadd [#allocation5], 4294966272 }
  0x47   :  { %556 = dma.done.wait [#allocation8], 512  }
  0x48   :  { %557 = vsyncadd [#allocation8], 4294966784  ;;  %vm97_vm0 = vcmask 261120   ;;  %v86_v0 = vld [vmem:[#allocation4] sm:$0xff]  ;;  %v87_v1 = vld [vmem:[#allocation4 + $0x8] sm:$0xff] }
  0x49   :  { %v88_v2 = vld [vmem:[#allocation4 + $0x10] sm:$0xff]  ;;  %v434_v3 = vpack.c.bf16 %v87_v1, %v86_v0  ;;  %v89_v4 = vld [vmem:[#allocation4 + $0x18] sm:$0xff]  ;;  %v183_v6 = vld [vmem:[#allocation6] sm:$0xff] }
  0x4a   :  { %v84_v5 = vld [vmem:[#allocation2] sm:$0xff]  ;;  %v438_v7 = vpack.c.bf16 %v89_v4, %v88_v2  ;;  %v184_v8 = vld [vmem:[#allocation6 + $0x8] sm:$0xff]  ;;  %v271_v9 = vld [vmem:[#allocation7] sm:$0xff] }
  0x4b   :  { %409 = vmatprep.mubr.msk.f32.mxu0 %vm97_vm0, %v84_v5  ;;  %420 = vmatprep.mubr.msk.f32.mxu1 %vm97_vm0, %v84_v5  ;;  %v442_v10 = vpack.c.bf16 %v184_v8, %v183_v6  ;;  %v272_v11 = vld [vmem:[#allocation7 + $0x8] sm:$0xff]  ;;  %v185_v12 = vld [vmem:[#allocation6 + $0x10] sm:$0xff]  ;;  %v186_v13 = vld [vmem:[#allocation6 + $0x18] sm:$0xff] }
  0x4c   :  { %435 = vmatprep.subr.bf16.mxu0 %v434_v3  ;;  %v446_v14 = vpack.c.bf16 %v186_v13, %v185_v12  ;;  %v450_v15 = vpack.c.bf16 %v272_v11, %v271_v9  ;;  %v273_v16 = vld [vmem:[#allocation7 + $0x10] sm:$0xff]  ;;  %v274_v17 = vld [vmem:[#allocation7 + $0x18] sm:$0xff] }
  0x4d   :  { %437 = vmatpush3.bf16.msra.mxu0 %v434_v3  ;;  %443 = vmatprep.subr.bf16.mxu1 %v442_v10  ;;  %v85_v18 = vld [vmem:[#allocation2 + $0x8] sm:$0xff]  ;;  %v454_v19 = vpack.c.bf16 %v274_v17, %v273_v16  ;;  %v374_v20 = vld [vmem:[%s729_s2] ss:$0 sm:$0xff] }
  0x4e   :  { %439 = vmatprep.subr.bf16.mxu0 %v438_v7  ;;  %445 = vmatpush3.bf16.msra.mxu1 %v442_v10  ;;  %v377_v22 = vld [vmem:[%s731_s4] ss:$0 sm:$0xff] }
  0x4f   :  { %447 = vmatprep.subr.bf16.mxu1 %v446_v14  ;;  %v380_v32 = vld [vmem:[%s733_s6] ss:$0 sm:$0xff] }
  0x51   :  { %441 = vmatpush3.bf16.msra.mxu0 %v438_v7 }
  0x52   :  { %451 = vmatprep.subr.bf16.mxu0 %v450_v15  ;;  %449 = vmatpush3.bf16.msra.mxu1 %v446_v14 }
  0x54   :  { %410 = vmatmul.mubr.msk.f32.vlgmr.msra.gmra.mrb[0].mxu0 %vm97_vm0, %v85_v18 }
  0x55   :  { %453 = vmatpush3.bf16.msra.mxu0 %v450_v15  ;;  %431 = vmatprep.mubr.msk.f32.mxu0 %vm97_vm0, %v84_v5 }
  0x56   :  { %455 = vmatprep.subr.bf16.mxu0 %v454_v19  ;;  %421 = vmatmul.mubr.msk.f32.vlgmr.msra.gmra.mrb[0].mxu1 %vm97_vm0, %v85_v18 }
  0x59   :  { %457 = vmatpush3.bf16.msra.mxu0 %v454_v19 }
  0x5c   :  { %432 = vmatmul.mubr.msk.f32.vlgmr.msra.gmra.mrb[2].mxu0 %vm97_vm0, %v85_v18 }
 0x127   :  { %v411_v21 = vpop.f32.mrb[0].mxu0 }
 0x128   :  { %v176_v23 = vadd.f32 %v411_v21, %v374_v20  ;;  %v170_v24 = vpop.f32.mrb[1].mxu0 }
 0x129   :  { %v171_v25 = vadd.f32 %v374_v20, %v170_v24  ;;  %v422_v26 = vpop.f32.mrb[0].mxu1 }
 0x12a   :  { %v180_v27 = vmul.f32 0.0009765625, %v176_v23  ;;  %v266_v28 = vadd.f32 %v422_v26, %v377_v22  ;;  %v260_v29 = vpop.f32.mrb[1].mxu1 }
 0x12b   :  { %v179_v30 = vmul.f32 0.0009765625, %v171_v25  ;;  %v261_v31 = vadd.f32 %v377_v22, %v260_v29 }
 0x12c   :  { %182 = vst.msk [vmem:[%s734_s7 + $0x8] sm:$0xff] %vm97_vm0, %v180_v27  ;;  %270 = vst.msk [vmem:[%s735_s8 + $0x8] sm:$0xff] %vm97_vm0, %v266_v28 }
 0x12d   :  { %181 = vst.msk [vmem:[%s734_s7] sm:$0xff] %vm97_vm0, %v179_v30  ;;  %269 = vst.msk [vmem:[%s735_s8] sm:$0xff] %vm97_vm0, %v261_v31 }
 0x12f   :  { %v433_v33 = vpop.f32.mrb[2].mxu0 }
 0x130   :  { %v354_v34 = vadd.f32 %v433_v33, %v380_v32  ;;  %v348_v35 = vpop.f32.mrb[3].mxu0 }
 0x131   :  { %v349_v36 = vadd.f32 %v380_v32, %v348_v35 }
 0x132   :  { %358 = vst.msk [vmem:[%s736_s9 + $0x8] sm:$0xff] %vm97_vm0, %v354_v34 }
 0x133   :  { %357 = vst.msk [vmem:[%s736_s9] sm:$0xff] %vm97_vm0, %v349_v36 }
 0x134   :  { %371 = vsyncpa [#allocation3], 1 }
 0x135   :  { %372 = vsyncpa [#allocation5], 1 }
 0x136   :  { %373 = vsyncpa [#allocation8], 1 }

</bundles_post_ra>
